<compile_context>
chip_gen: v7x
topology: tpu7x:2x2x1
jax: 0.10.0
libtpu: 0.0.40
codegen_flags: <defaults>
</compile_context>

<pallas_src>
import functools

import jax
import jax.numpy as jnp
from jax.experimental import pallas as pl
from jax.experimental.pallas import tpu as pltpu

EXPANSION = 4                    # Bottleneck expansion factor (ResNet-50)
VMEM_LIMIT = 48 * 1024 * 1024    # safe on v5e/v6e (128 MiB) and v7x (64 MiB) physical VMEM
TM_MAX = 256                     # row tile for the pointwise matmul kernel
TN_MAX = 256                     # col tile for the pointwise matmul kernel


def _round_up(x, m):
    return (x + m - 1) // m * m


# ----------------------------------------------------------------------------
# Pallas kernel 1: pointwise (1x1 conv) matmul + bias (+ residual) (+ ReLU)
#   x (tm, K) bf16 @ w (K, tn) bf16 -> f32 acc -> + bias (+ residual) -> relu -> bf16
#   K is a single full block, so there is no k-loop and no scratch accumulator.
# ----------------------------------------------------------------------------
def _pointwise_kernel(*refs, relu, has_res):
    if has_res:
        x_ref, w_ref, b_ref, r_ref, o_ref = refs
    else:
        x_ref, w_ref, b_ref, o_ref = refs
        r_ref = None
    acc = jnp.dot(x_ref[...], w_ref[...], preferred_element_type=jnp.float32)
    y = acc + b_ref[...]
    if r_ref is not None:
        y = y + r_ref[...].astype(jnp.float32)
    if relu:
        y = jnp.maximum(y, 0.0)
    o_ref[...] = y.astype(o_ref.dtype)


def pointwise_matmul(x, w, bias, residual=None, relu=True):
    """out = [relu]((x @ w) + bias [+ residual]); x/w/residual bf16, bias f32."""
    M, K = x.shape
    _, N = w.shape

    tm = M if M <= TM_MAX else TM_MAX
    tn = N if N <= TN_MAX else TN_MAX
    Mp, Np = _round_up(M, tm), _round_up(N, tn)

    xp = x if Mp == M else jnp.pad(x, ((0, Mp - M), (0, 0)))
    wp = w if Np == N else jnp.pad(w, ((0, 0), (0, Np - N)))
    bp = bias if Np == N else jnp.pad(bias, ((0, 0), (0, Np - N)))

    in_specs = [
        pl.BlockSpec((tm, K), lambda i, j: (i, 0)),   # full-K block -> single step
        pl.BlockSpec((K, tn), lambda i, j: (0, j)),
        pl.BlockSpec((1, tn), lambda i, j: (0, j)),
    ]
    args = [xp, wp, bp]
    has_res = residual is not None
    if has_res:
        rp = residual
        if Mp != M or Np != N:
            rp = jnp.pad(residual, ((0, Mp - M), (0, Np - N)))
        in_specs.append(pl.BlockSpec((tm, tn), lambda i, j: (i, j)))
        args.append(rp)

    out = pl.pallas_call(
        functools.partial(_pointwise_kernel, relu=relu, has_res=has_res),
        out_shape=jax.ShapeDtypeStruct((Mp, Np), jnp.bfloat16),
        grid_spec=pltpu.PrefetchScalarGridSpec(
            num_scalar_prefetch=0,
            grid=(Mp // tm, Np // tn),
            in_specs=in_specs,
            out_specs=pl.BlockSpec((tm, tn), lambda i, j: (i, j))),
        compiler_params=pltpu.CompilerParams(
            dimension_semantics=("parallel", "parallel"),
            vmem_limit_bytes=VMEM_LIMIT),
    )(*args)
    if Mp != M or Np != N:
        out = out[:M, :N]
    return out


def conv1x1(x, w, bias, *, stride=1, residual=None, relu=True):
    """1x1 conv (+ folded BN bias, optional residual, optional ReLU), NHWC bf16."""
    if stride != 1:
        x = x[:, ::stride, ::stride, :]   # exact for kernel-1 / pad-0 convolutions
    n, h, wd, c = x.shape
    cout = w.shape[-1]
    xm = x.reshape(n * h * wd, c)
    rm = residual.reshape(n * h * wd, cout) if residual is not None else None
    out = pointwise_matmul(xm, w, bias, residual=rm, relu=relu)
    return out.reshape(n, h, wd, cout)


# ----------------------------------------------------------------------------
# Pallas kernel 2: 3x3 conv (padding=1) via in-kernel 9-tap accumulation.
# The padded activation for one image is resident in VMEM as (Hp*Wp, C); each tap
# (di, dj) is the statically shifted slice [di*Wp+dj : di*Wp+dj+H*Wp) of that block,
# matmul'd with the (C, Cout) weight slice and accumulated in f32.
# ----------------------------------------------------------------------------
def _conv3x3_kernel(x_ref, w_ref, b_ref, o_ref, *, rows, wpad, relu):
    acc = None
    for di in range(3):
        for dj in range(3):
            t = di * 3 + dj
            off = di * wpad + dj                       # static shift
            win = x_ref[0, off:off + rows, :]          # (rows, C) bf16
            part = jnp.dot(win, w_ref[t], preferred_element_type=jnp.float32)
            acc = part if acc is None else acc + part
    y = acc + b_ref[...]
    if relu:
        y = jnp.maximum(y, 0.0)
    o_ref[0] = y.astype(o_ref.dtype)


def conv3x3(x, w9, bias, *, stride=1, relu=True):
    """3x3 / padding=1 conv (+ folded BN bias, optional ReLU), NHWC bf16.
    x: (N,H,W,C);  w9: (9,C,Cout) = (3,3,C,Cout) reshaped;  bias: (1,Cout) f32."""
    n, h, w, c = x.shape
    cout = w9.shape[-1]
    wp_ = w + 2
    rows = h * wp_   # stride-1 outputs in flattened (padded-width) form; the 2 extra
                     # columns per row are junk and sliced off below.
    # pad: 1 top/left/right, 2 bottom (the extra zero row keeps the shifted tap slices
    # in bounds; the rows it feeds are junk rows that are discarded anyway).
    xpad = jnp.pad(x, ((0, 0), (1, 2), (1, 1), (0, 0)))
    xflat = xpad.reshape(n, (h + 3) * wp_, c)

    z = pl.pallas_call(
        functools.partial(_conv3x3_kernel, rows=rows, wpad=wp_, relu=relu),
        out_shape=jax.ShapeDtypeStruct((n, rows, cout), jnp.bfloat16),
        grid_spec=pltpu.PrefetchScalarGridSpec(
            num_scalar_prefetch=0,
            grid=(n,),
            in_specs=[
                pl.BlockSpec((1, (h + 3) * wp_, c), lambda i: (i, 0, 0)),
                pl.BlockSpec((9, c, cout), lambda i: (0, 0, 0)),
                pl.BlockSpec((1, cout), lambda i: (0, 0)),
            ],
            out_specs=pl.BlockSpec((1, rows, cout), lambda i: (i, 0, 0))),
        compiler_params=pltpu.CompilerParams(
            dimension_semantics=("parallel",),
            vmem_limit_bytes=VMEM_LIMIT),
    )(xflat, w9, bias)

    y = z.reshape(n, h, wp_, cout)[:, :, :w, :]
    if stride != 1:
        # stride-s output == stride-1 output subsampled (only 2 such convs in the net).
        y = y[:, ::stride, ::stride, :]
    return y


# ----------------------------------------------------------------------------
# Parameters (deterministic, synthetic); BN folded + weights pre-laid-out at init
# ----------------------------------------------------------------------------
def _he(key, shape):
    kh, kw, cin, _ = shape
    fan_in = kh * kw * cin
    return jax.random.normal(key, shape, jnp.float32) * jnp.sqrt(2.0 / fan_in)


def _conv_bn_param(key, kh, kw, cin, cout):
    w = _he(key, (kh, kw, cin, cout))
    bn_scale = jnp.ones((cout,), jnp.float32)     # inference-mode folded BN scale
    bn_bias = jnp.zeros((cout,), jnp.float32)     # inference-mode folded BN bias
    wf = (w * bn_scale[None, None, None, :]).astype(jnp.bfloat16)
    if kh == 1 and kw == 1:
        wf = wf.reshape(cin, cout)                # matmul-ready layout
    else:
        wf = wf.reshape(kh * kw, cin, cout)       # tap-major layout for the 3x3 kernel
    return {'w': wf, 'b': bn_bias.reshape(1, cout)}


def _make_layer(key, inplanes, planes, blocks, stride):
    params = []
    for b in range(blocks):
        s = stride if b == 0 else 1
        in_c = inplanes if b == 0 else planes * EXPANSION
        key, k1, k2, k3, kd = jax.random.split(key, 5)
        blk = {
            'stride': s,
            'conv1': _conv_bn_param(k1, 1, 1, in_c, planes),
            'conv2': _conv_bn_param(k2, 3, 3, planes, planes),
            'conv3': _conv_bn_param(k3, 1, 1, planes, planes * EXPANSION),
        }
        if b == 0 and (s != 1 or in_c != planes * EXPANSION):
            blk['down'] = _conv_bn_param(kd, 1, 1, in_c, planes * EXPANSION)
        params.append(blk)
    return params, key


def init_nir_resnet_params(key, base_width):
    # ResNet-50 layer1..layer4; layer4 stride=1 because last_conv_stride=1 and
    # dilation=1 because last_conv_dilation=1.  base_width=64 is the real width;
    # a reduced width keeps this demo small & fast.
    inplanes = base_width
    params = {}
    cfg = [('layer1', base_width, 3, 1),
           ('layer2', base_width * 2, 4, 2),
           ('layer3', base_width * 4, 6, 2),
           ('layer4', base_width * 8, 3, 1)]
    for name, planes, blocks, stride in cfg:
        layer, key = _make_layer(key, inplanes, planes, blocks, stride)
        params[name] = layer
        inplanes = planes * EXPANSION
    return params


def _bottleneck(x, p):
    out = conv1x1(x, p['conv1']['w'], p['conv1']['b'], relu=True)
    out = conv3x3(out, p['conv2']['w'], p['conv2']['b'],
                  stride=p['stride'], relu=True)
    if 'down' in p:
        identity = conv1x1(x, p['down']['w'], p['down']['b'],
                           stride=p['stride'], relu=False)
    else:
        identity = x
    # conv3 + bn3 + residual add + ReLU fused in one Pallas kernel
    out = conv1x1(out, p['conv3']['w'], p['conv3']['b'],
                  residual=identity, relu=True)
    return out


def nir_resnet_forward(params, x_nchw):
    x = jnp.transpose(x_nchw, (0, 2, 3, 1)).astype(jnp.bfloat16)   # NCHW -> NHWC bf16
    for name in ('layer1', 'layer2', 'layer3', 'layer4'):
        for blk in params[name]:
            x = _bottleneck(x, blk)
    return jnp.transpose(x, (0, 3, 1, 2)).astype(jnp.float32)       # NHWC -> NCHW f32


if __name__ == "__main__":
    BASE = 8   # width-reduced ResNet-50 (real model: 64) to keep shapes small
    key = jax.random.PRNGKey(0)
    pkey, xkey = jax.random.split(key)
    params = init_nir_resnet_params(pkey, BASE)

    # Input is what the backbone (layer1..layer4) expects: the stem output, NCHW.
    x = jax.random.normal(xkey, (2, BASE, 16, 16), jnp.float32)

    y = nir_resnet_forward(params, x)
    y = jax.block_until_ready(y)
    assert y.shape == (2, BASE * 8 * EXPANSION, 4, 4), y.shape
    assert bool(jnp.all(jnp.isfinite(y)))
    print("KERNEL_OK")
</pallas_src>

<mosaic_0001>
module attributes {stable_mosaic.version = 11 : i64} {
  func.func @_pointwise_kernel(%arg0: i32, %arg1: i32, %arg2: memref<256x8xbf16, #tpu.memory_space<vmem>>, %arg3: memref<8x8xbf16, #tpu.memory_space<vmem>>, %arg4: memref<1x8xf32, #tpu.memory_space<vmem>>, %arg5: memref<256x8xbf16, #tpu.memory_space<vmem>>) attributes {dimension_semantics = [#tpu.dimension_semantics<parallel>, #tpu.dimension_semantics<parallel>], iteration_bounds = array<i64: 2, 1>, scalar_prefetch = 0 : i64, scratch_operands = 0 : i64, tpu.core_type = #tpu.core_type<tc>, window_params = [{transform_indices = @transform_0, window_bounds = array<i64: 256, 8>}, {transform_indices = @transform_1, window_bounds = array<i64: 8, 8>}, {transform_indices = @transform_2, window_bounds = array<i64: 1, 8>}, {transform_indices = @transform_3, window_bounds = array<i64: 256, 8>}]} {
    %c0 = arith.constant 0 : index
    %c0_0 = arith.constant 0 : index
    %0 = vector.load %arg2[%c0, %c0_0] : memref<256x8xbf16, #tpu.memory_space<vmem>>, vector<256x8xbf16>
    %c0_1 = arith.constant 0 : index
    %c0_2 = arith.constant 0 : index
    %1 = vector.load %arg3[%c0_1, %c0_2] : memref<8x8xbf16, #tpu.memory_space<vmem>>, vector<8x8xbf16>
    %cst = arith.constant dense<0.000000e+00> : vector<256x8xf32>
    %2 = tpu.matmul %0, %1, %cst {dimension_numbers = #tpu.dot_dimension_numbers<[1], [0], [0], [1], [0, 0, 1, 1], [], []>} : vector<256x8xbf16>, vector<8x8xbf16>, vector<256x8xf32> -> vector<256x8xf32>
    %c0_3 = arith.constant 0 : index
    %c0_4 = arith.constant 0 : index
    %3 = vector.load %arg4[%c0_3, %c0_4] : memref<1x8xf32, #tpu.memory_space<vmem>>, vector<1x8xf32>
    %4 = vector.broadcast %3 : vector<1x8xf32> to vector<256x8xf32>
    %5 = arith.addf %2, %4 : vector<256x8xf32>
    %cst_5 = arith.constant 0.000000e+00 : f32
    %6 = vector.broadcast %cst_5 : f32 to vector<256x8xf32>
    %7 = arith.maximumf %5, %6 : vector<256x8xf32>
    %8 = arith.truncf %7 : vector<256x8xf32> to vector<256x8xbf16>
    %c0_6 = arith.constant 0 : index
    %c0_7 = arith.constant 0 : index
    %9 = vector.load %arg5[%c0_6, %c0_7] : memref<256x8xbf16, #tpu.memory_space<vmem>>, vector<256x8xbf16>
    tpu.vector_store %arg5[%c0_6, %c0_7], %8 {strides = array<i32>} : memref<256x8xbf16, #tpu.memory_space<vmem>>, vector<256x8xbf16>,
    return
  }
  func.func @transform_0(%arg0: i32, %arg1: i32) -> (i32, i32) {
    %c0_i32 = arith.constant 0 : i32
    %c0_i32_0 = arith.constant 0 : i32
    return %arg0, %c0_i32 : i32, i32
  }
  func.func @transform_1(%arg0: i32, %arg1: i32) -> (i32, i32) {
    %c0_i32 = arith.constant 0 : i32
    %c0_i32_0 = arith.constant 0 : i32
    return %c0_i32, %arg1 : i32, i32
  }
  func.func @transform_2(%arg0: i32, %arg1: i32) -> (i32, i32) {
    %c0_i32 = arith.constant 0 : i32
    %c0_i32_0 = arith.constant 0 : i32
    return %c0_i32, %arg1 : i32, i32
  }
  func.func @transform_3(%arg0: i32, %arg1: i32) -> (i32, i32) {
    %c0_i32 = arith.constant 0 : i32
    return %arg0, %arg1 : i32, i32
  }
}

</mosaic_0001>

<bundles_post_ra>
// kernel: tpu_custom_call.1
= control target key start
LH: loop header
LB: loop body
LE: loop exit
PB: predicated region body
PF: predicated region fallthrough
CT: control target
= control target key end

     0   :  { %s1104_s12 = smov 0   ;;  %s1106_s13 = smov 0   ;;  %s1284_s0 = inlined_call_operand.vmem [shape: bf16[512,8], index: 0, kind: input, shape index: {}]   ;;  %s1285_s1 = inlined_call_operand.vmem [shape: bf16[8,8], index: 1, kind: input, shape index: {}]   ;;  %s1286_s2 = inlined_call_operand.vmem [shape: f32[1,8], index: 2, kind: input, shape index: {}]   ;;  %s1287_s3 = inlined_call_operand.vmem [shape: bf16[512,8], index: 3, kind: output, shape index: {}]  }
   0x1   :  { %s1108_s14 = smov 0  }
   0x2 LB: > { %s25_s15 = sadd.s32 1, %s1078_s13  ;;  %p861_p0 = scmp.ge.s32.totalorder %s1082_s14, 1  ;;  %s1082_s14 = sphi %s1108_s14, %s13_s14   ;;  %s1078_s13 = sphi %s1106_s13, %s1289_s13   ;;  %s1074_s12 = sphi %s1104_s12, %s1288_s12  }
   0x3   : > { %p27_p1 = scmp.ge.s32.totalorder %s25_s15, 2  ;;  %p169_p2 = scmp.lt.s32.totalorder %s1082_s14, 3 }
   0x5   : > { %s1291_s15 = smov (%p27_p1, %s25_s15), 0  ;;  %p170_p3 = pnand %p861_p0, %p169_p2 }
   0x6   : > { %v258_v0 = vld [vmem:[%s1285_s1] sm:$0xf] (!%p170_p3)  ;;  %vm395_vm0 = vcmask (!%p170_p3), 1043456   ;;  %s862_s18 = sshll.u32 (!%p170_p3), %s1074_s12, 5  ;;  %vm346_vm1 = vcmask (!%p170_p3), 64512   ;;  %vm720_vm2 = vcmask (!%p170_p3), 60416  }
   0x7   : > { %173 = sbr.rel (%p170_p3) target bundleno = 266 (0x10a), region = 32  ;;  %1018 = vmatprep.subr.msk.bf16.mxu0 (!%p170_p3), %vm395_vm0, %v258_v0  ;;  %1019 = vmatprep.subr.msk.bf16.mxu1 (!%p170_p3), %vm395_vm0, %v258_v0  ;;  %v397_v1 = vsel (!%p170_p3), %vm395_vm0, %v258_v0, 0  ;;  %p204_p4 = scmp.lt.s32.totalorder (!%p170_p3), %s862_s18, 63  ;;  %v1170_v18 = vld [vmem:[%s1286_s2] ss:$0 sm:$0xff] (!%p170_p3) }
   0x8   : > { %983 = vmatpush3.bf16.msra.mxu0 (!%p170_p3), %v397_v1  ;;  %1017 = vmatpush3.bf16.msra.mxu1 (!%p170_p3), %v397_v1 }
   0xe   : > { %s1293_s18 = smov (!%p204_p4, %s862_s18), 63 }
   0xf   : > { %s863_s19 = sshll.u32 %s1293_s18, 2 }
  0x10   : > { %s1133_s22 = scalar_lea.vmem %s1284_s0, %s863_s19  ;;  %s1182_s27 = scalar_lea.vmem %s1287_s3, %s863_s19 }
  0x11   : > { %v1044_v2 = vld [vmem:[%s1133_s22] sm:$0xff]   ;;  %v1046_v4 = vld [vmem:[%s1133_s22 + $0x8] sm:$0xff]   ;;  %v1048_v6 = vld [vmem:[%s1133_s22 + $0x10] sm:$0xff]  }
  0x12   : > { %v1045_v3 = vld [vmem:[%s1133_s22 + $0x40] sm:$0xff]   ;;  %984 = vmatprep.mubr.msk.bf16.mxu0 %vm346_vm1, %v1044_v2  ;;  %v1047_v5 = vld [vmem:[%s1133_s22 + $0x48] sm:$0xff]   ;;  %v1049_v7 = vld [vmem:[%s1133_s22 + $0x50] sm:$0xff]  }
  0x13   : > { %1000 = vmatprep.mubr.msk.bf16.mxu1 %vm346_vm1, %v1045_v3  ;;  %985 = vmatmul.mubr.msk.bf16.vlgmr.msra.gmra.mrb[0].mxu0 %vm346_vm1, %v1046_v4  ;;  %v1050_v8 = vld [vmem:[%s1133_s22 + $0x18] sm:$0xff]   ;;  %v1052_v10 = vld [vmem:[%s1133_s22 + $0x20] sm:$0xff]   ;;  %v1054_v12 = vld [vmem:[%s1133_s22 + $0x28] sm:$0xff]  }
  0x14   : > { %1001 = vmatmul.mubr.msk.bf16.vlgmr.msra.gmra.mrb[0].mxu1 %vm346_vm1, %v1047_v5  ;;  %988 = vmatprep.mubr.msk.bf16.mxu0 %vm346_vm1, %v1048_v6  ;;  %v1051_v9 = vld [vmem:[%s1133_s22 + $0x58] sm:$0xff]   ;;  %v1053_v11 = vld [vmem:[%s1133_s22 + $0x60] sm:$0xff]   ;;  %v1055_v13 = vld [vmem:[%s1133_s22 + $0x68] sm:$0xff]  }
  0x15   : > { %1004 = vmatprep.mubr.msk.bf16.mxu1 %vm346_vm1, %v1049_v7  ;;  %v1056_v14 = vld [vmem:[%s1133_s22 + $0x30] sm:$0xff]   ;;  %v1058_v16 = vld [vmem:[%s1133_s22 + $0x38] sm:$0xff]  }
  0x16   : > { %v1057_v15 = vld [vmem:[%s1133_s22 + $0x70] sm:$0xff]   ;;  %v1059_v17 = vld [vmem:[%s1133_s22 + $0x78] sm:$0xff]  }
  0x1b   : > { %989 = vmatmul.mubr.msk.bf16.gmra.mrb[4].mxu0 %vm346_vm1, %v1050_v8 }
  0x1c   : > { %1005 = vmatmul.mubr.msk.bf16.gmra.mrb[4].mxu1 %vm346_vm1, %v1051_v9  ;;  %992 = vmatprep.mubr.msk.bf16.mxu0 %vm346_vm1, %v1052_v10 }
  0x1d   : > { %1008 = vmatprep.mubr.msk.bf16.mxu1 %vm346_vm1, %v1053_v11 }
  0x23   : > { %993 = vmatmul.mubr.msk.bf16.gmra.mrb[8].mxu0 %vm346_vm1, %v1054_v12 }
  0x24   : > { %1009 = vmatmul.mubr.msk.bf16.gmra.mrb[8].mxu1 %vm346_vm1, %v1055_v13  ;;  %996 = vmatprep.mubr.msk.bf16.mxu0 %vm346_vm1, %v1056_v14 }
  0x25   : > { %1012 = vmatprep.mubr.msk.bf16.mxu1 %vm346_vm1, %v1057_v15 }
  0x2b   : > { %997 = vmatmul.mubr.msk.bf16.gmra.mrb[12].mxu0 %vm346_vm1, %v1058_v16 }
  0x2c   : > { %1013 = vmatmul.mubr.msk.bf16.gmra.mrb[12].mxu1 %vm346_vm1, %v1059_v17 }
  0xe6   : > { %v986_v19 = vpop.f32.mrb[0].mxu0 }
  0xe7   : > { %v442_v20 = vadd.f32 %v986_v19, %v1170_v18  ;;  %v1002_v21 = vpop.f32.mrb[0].mxu1  ;;  %v433_v22 = vpop.f32.mrb[1].mxu0 }
  0xe8   : > { %v506_v23 = vadd.f32 %v1002_v21, %v1170_v18  ;;  %v434_v24 = vadd.f32 %v1170_v18, %v433_v22  ;;  %v497_v25 = vpop.f32.mrb[1].mxu1  ;;  %v987_v26 = vpop.f32.mrb[2].mxu0 }
  0xe9   : > { %v562_v27 = vmax.f32 %v442_v20, 0.0  ;;  %v498_v28 = vadd.f32 %v1170_v18, %v497_v25  ;;  %v445_v29 = vadd.f32 %v987_v26, %v1170_v18  ;;  %v1003_v30 = vpop.f32.mrb[2].mxu1  ;;  %v436_v31 = vpop.f32.mrb[3].mxu0 }
  0xea   : > { %v578_v32 = vmax.f32 %v506_v23, 0.0  ;;  %v560_v33 = vmax.f32 %v434_v24, 0.0  ;;  %v509_v34 = vadd.f32 %v1003_v30, %v1170_v18  ;;  %v437_v35 = vadd.f32 %v1170_v18, %v436_v31  ;;  %v500_v36 = vpop.f32.mrb[3].mxu1 }
  0xeb   : > { %v935_v37 = vpack.c.bf16 %v562_v27, %v562_v27  ;;  %v576_v38 = vmax.f32 %v498_v28, 0.0  ;;  %v563_v39 = vmax.f32 %v445_v29, 0.0  ;;  %v501_v40 = vadd.f32 %v1170_v18, %v500_v36 }
  0xec   : > { %v951_v41 = vpack.c.bf16 %v578_v32, %v578_v32  ;;  %v933_v42 = vpack.c.bf16 %v560_v33, %v560_v33  ;;  %v579_v43 = vmax.f32 %v509_v34, 0.0  ;;  %v561_v44 = vmax.f32 %v437_v35, 0.0 }
  0xed   : > { %723 = vst.msk [vmem:[%s1182_s27 + $0x8] sm:$0xf] %vm720_vm2, %v935_v37  ;;  %v949_v45 = vpack.c.bf16 %v576_v38, %v576_v38  ;;  %v936_v46 = vpack.c.bf16 %v563_v39, %v563_v39  ;;  %v577_v47 = vmax.f32 %v501_v40, 0.0 }
  0xee   : > { %739 = vst.msk [vmem:[%s1182_s27 + $0x48] sm:$0xf] %vm720_vm2, %v951_v41  ;;  %721 = vst.msk [vmem:[%s1182_s27] sm:$0xf] %vm720_vm2, %v933_v42  ;;  %v952_v48 = vpack.c.bf16 %v579_v43, %v579_v43  ;;  %v934_v49 = vpack.c.bf16 %v561_v44, %v561_v44  ;;  %v990_v50 = vpop.f32.mrb[4].mxu0 }
  0xef   : > { %737 = vst.msk [vmem:[%s1182_s27 + $0x40] sm:$0xf] %vm720_vm2, %v949_v45  ;;  %724 = vst.msk [vmem:[%s1182_s27 + $0xc] sm:$0xf] %vm720_vm2, %v936_v46  ;;  %v950_v51 = vpack.c.bf16 %v577_v47, %v577_v47  ;;  %v458_v52 = vadd.f32 %v990_v50, %v1170_v18  ;;  %v1006_v53 = vpop.f32.mrb[4].mxu1  ;;  %v449_v54 = vpop.f32.mrb[5].mxu0 }
  0xf0   : > { %740 = vst.msk [vmem:[%s1182_s27 + $0x4c] sm:$0xf] %vm720_vm2, %v952_v48  ;;  %722 = vst.msk [vmem:[%s1182_s27 + $0x4] sm:$0xf] %vm720_vm2, %v934_v49  ;;  %v522_v55 = vadd.f32 %v1006_v53, %v1170_v18  ;;  %v450_v56 = vadd.f32 %v1170_v18, %v449_v54  ;;  %v513_v57 = vpop.f32.mrb[5].mxu1  ;;  %v991_v58 = vpop.f32.mrb[6].mxu0 }
  0xf1   : > { %738 = vst.msk [vmem:[%s1182_s27 + $0x44] sm:$0xf] %vm720_vm2, %v950_v51  ;;  %v566_v59 = vmax.f32 %v458_v52, 0.0  ;;  %v514_v60 = vadd.f32 %v1170_v18, %v513_v57  ;;  %v461_v61 = vadd.f32 %v991_v58, %v1170_v18  ;;  %v1007_v62 = vpop.f32.mrb[6].mxu1  ;;  %v452_v63 = vpop.f32.mrb[7].mxu0 }
  0xf2   : > { %v582_v0 = vmax.f32 %v522_v55, 0.0  ;;  %v564_v1 = vmax.f32 %v450_v56, 0.0  ;;  %v525_v2 = vadd.f32 %v1007_v62, %v1170_v18  ;;  %v453_v3 = vadd.f32 %v1170_v18, %v452_v63  ;;  %v516_v4 = vpop.f32.mrb[7].mxu1 }
  0xf3   : > { %v939_v5 = vpack.c.bf16 %v566_v59, %v566_v59  ;;  %v580_v6 = vmax.f32 %v514_v60, 0.0  ;;  %v567_v7 = vmax.f32 %v461_v61, 0.0  ;;  %v517_v8 = vadd.f32 %v1170_v18, %v516_v4 }
  0xf4   : > { %v955_v9 = vpack.c.bf16 %v582_v0, %v582_v0  ;;  %v937_v10 = vpack.c.bf16 %v564_v1, %v564_v1  ;;  %v583_v11 = vmax.f32 %v525_v2, 0.0  ;;  %v565_v12 = vmax.f32 %v453_v3, 0.0 }
  0xf5   : > { %727 = vst.msk [vmem:[%s1182_s27 + $0x18] sm:$0xf] %vm720_vm2, %v939_v5  ;;  %v953_v13 = vpack.c.bf16 %v580_v6, %v580_v6  ;;  %v940_v14 = vpack.c.bf16 %v567_v7, %v567_v7  ;;  %v581_v15 = vmax.f32 %v517_v8, 0.0 }
  0xf6   : > { %743 = vst.msk [vmem:[%s1182_s27 + $0x58] sm:$0xf] %vm720_vm2, %v955_v9  ;;  %725 = vst.msk [vmem:[%s1182_s27 + $0x10] sm:$0xf] %vm720_vm2, %v937_v10  ;;  %v956_v16 = vpack.c.bf16 %v583_v11, %v583_v11  ;;  %v938_v17 = vpack.c.bf16 %v565_v12, %v565_v12  ;;  %v994_v19 = vpop.f32.mrb[8].mxu0 }
  0xf7   : > { %741 = vst.msk [vmem:[%s1182_s27 + $0x50] sm:$0xf] %vm720_vm2, %v953_v13  ;;  %728 = vst.msk [vmem:[%s1182_s27 + $0x1c] sm:$0xf] %vm720_vm2, %v940_v14  ;;  %v954_v20 = vpack.c.bf16 %v581_v15, %v581_v15  ;;  %v474_v21 = vadd.f32 %v994_v19, %v1170_v18  ;;  %v1010_v22 = vpop.f32.mrb[8].mxu1  ;;  %v465_v23 = vpop.f32.mrb[9].mxu0 }
  0xf8   : > { %744 = vst.msk [vmem:[%s1182_s27 + $0x5c] sm:$0xf] %vm720_vm2, %v956_v16  ;;  %726 = vst.msk [vmem:[%s1182_s27 + $0x14] sm:$0xf] %vm720_vm2, %v938_v17  ;;  %v538_v24 = vadd.f32 %v1010_v22, %v1170_v18  ;;  %v466_v25 = vadd.f32 %v1170_v18, %v465_v23  ;;  %v529_v26 = vpop.f32.mrb[9].mxu1  ;;  %v995_v27 = vpop.f32.mrb[10].mxu0 }
  0xf9   : > { %742 = vst.msk [vmem:[%s1182_s27 + $0x54] sm:$0xf] %vm720_vm2, %v954_v20  ;;  %v570_v28 = vmax.f32 %v474_v21, 0.0  ;;  %v530_v29 = vadd.f32 %v1170_v18, %v529_v26  ;;  %v477_v30 = vadd.f32 %v995_v27, %v1170_v18  ;;  %v1011_v31 = vpop.f32.mrb[10].mxu1  ;;  %v468_v32 = vpop.f32.mrb[11].mxu0 }
  0xfa   : > { %v586_v33 = vmax.f32 %v538_v24, 0.0  ;;  %v568_v34 = vmax.f32 %v466_v25, 0.0  ;;  %v541_v35 = vadd.f32 %v1011_v31, %v1170_v18  ;;  %v469_v36 = vadd.f32 %v1170_v18, %v468_v32  ;;  %v532_v37 = vpop.f32.mrb[11].mxu1 }
  0xfb   : > { %v943_v38 = vpack.c.bf16 %v570_v28, %v570_v28  ;;  %v584_v39 = vmax.f32 %v530_v29, 0.0  ;;  %v571_v40 = vmax.f32 %v477_v30, 0.0  ;;  %v533_v41 = vadd.f32 %v1170_v18, %v532_v37 }
  0xfc   : > { %v959_v42 = vpack.c.bf16 %v586_v33, %v586_v33  ;;  %v941_v43 = vpack.c.bf16 %v568_v34, %v568_v34  ;;  %v587_v44 = vmax.f32 %v541_v35, 0.0  ;;  %v569_v45 = vmax.f32 %v469_v36, 0.0 }
  0xfd   : > { %731 = vst.msk [vmem:[%s1182_s27 + $0x28] sm:$0xf] %vm720_vm2, %v943_v38  ;;  %v957_v46 = vpack.c.bf16 %v584_v39, %v584_v39  ;;  %v944_v47 = vpack.c.bf16 %v571_v40, %v571_v40  ;;  %v585_v48 = vmax.f32 %v533_v41, 0.0 }
  0xfe   : > { %747 = vst.msk [vmem:[%s1182_s27 + $0x68] sm:$0xf] %vm720_vm2, %v959_v42  ;;  %729 = vst.msk [vmem:[%s1182_s27 + $0x20] sm:$0xf] %vm720_vm2, %v941_v43  ;;  %v960_v49 = vpack.c.bf16 %v587_v44, %v587_v44  ;;  %v942_v50 = vpack.c.bf16 %v569_v45, %v569_v45  ;;  %v998_v51 = vpop.f32.mrb[12].mxu0 }
  0xff   : > { %745 = vst.msk [vmem:[%s1182_s27 + $0x60] sm:$0xf] %vm720_vm2, %v957_v46  ;;  %732 = vst.msk [vmem:[%s1182_s27 + $0x2c] sm:$0xf] %vm720_vm2, %v944_v47  ;;  %v958_v52 = vpack.c.bf16 %v585_v48, %v585_v48  ;;  %v490_v53 = vadd.f32 %v998_v51, %v1170_v18  ;;  %v1014_v54 = vpop.f32.mrb[12].mxu1  ;;  %v481_v55 = vpop.f32.mrb[13].mxu0 }
 0x100   : > { %748 = vst.msk [vmem:[%s1182_s27 + $0x6c] sm:$0xf] %vm720_vm2, %v960_v49  ;;  %730 = vst.msk [vmem:[%s1182_s27 + $0x24] sm:$0xf] %vm720_vm2, %v942_v50  ;;  %v554_v56 = vadd.f32 %v1014_v54, %v1170_v18  ;;  %v482_v57 = vadd.f32 %v1170_v18, %v481_v55  ;;  %v545_v58 = vpop.f32.mrb[13].mxu1  ;;  %v999_v59 = vpop.f32.mrb[14].mxu0 }
 0x101   : > { %746 = vst.msk [vmem:[%s1182_s27 + $0x64] sm:$0xf] %vm720_vm2, %v958_v52  ;;  %v574_v60 = vmax.f32 %v490_v53, 0.0  ;;  %v546_v61 = vadd.f32 %v1170_v18, %v545_v58  ;;  %v493_v62 = vadd.f32 %v999_v59, %v1170_v18  ;;  %v1015_v63 = vpop.f32.mrb[14].mxu1  ;;  %v484_v0 = vpop.f32.mrb[15].mxu0 }
 0x102   : > { %v590_v1 = vmax.f32 %v554_v56, 0.0  ;;  %v572_v2 = vmax.f32 %v482_v57, 0.0  ;;  %v557_v3 = vadd.f32 %v1015_v63, %v1170_v18  ;;  %v485_v4 = vadd.f32 %v1170_v18, %v484_v0  ;;  %v548_v5 = vpop.f32.mrb[15].mxu1 }
 0x103   : > { %v947_v6 = vpack.c.bf16 %v574_v60, %v574_v60  ;;  %v588_v7 = vmax.f32 %v546_v61, 0.0  ;;  %v575_v8 = vmax.f32 %v493_v62, 0.0  ;;  %v549_v9 = vadd.f32 %v1170_v18, %v548_v5 }
 0x104   : > { %v963_v10 = vpack.c.bf16 %v590_v1, %v590_v1  ;;  %v945_v11 = vpack.c.bf16 %v572_v2, %v572_v2  ;;  %v591_v12 = vmax.f32 %v557_v3, 0.0  ;;  %v573_v13 = vmax.f32 %v485_v4, 0.0 }
 0x105   : > { %735 = vst.msk [vmem:[%s1182_s27 + $0x38] sm:$0xf] %vm720_vm2, %v947_v6  ;;  %v961_v14 = vpack.c.bf16 %v588_v7, %v588_v7  ;;  %v948_v15 = vpack.c.bf16 %v575_v8, %v575_v8  ;;  %v589_v16 = vmax.f32 %v549_v9, 0.0 }
 0x106   : > { %751 = vst.msk [vmem:[%s1182_s27 + $0x78] sm:$0xf] %vm720_vm2, %v963_v10  ;;  %733 = vst.msk [vmem:[%s1182_s27 + $0x30] sm:$0xf] %vm720_vm2, %v945_v11  ;;  %v964_v17 = vpack.c.bf16 %v591_v12, %v591_v12  ;;  %v946_v19 = vpack.c.bf16 %v573_v13, %v573_v13 }
 0x107   : > { %749 = vst.msk [vmem:[%s1182_s27 + $0x70] sm:$0xf] %vm720_vm2, %v961_v14  ;;  %736 = vst.msk [vmem:[%s1182_s27 + $0x3c] sm:$0xf] %vm720_vm2, %v948_v15  ;;  %v962_v18 = vpack.c.bf16 %v589_v16, %v589_v16 }
 0x108   : > { %752 = vst.msk [vmem:[%s1182_s27 + $0x7c] sm:$0xf] %vm720_vm2, %v964_v17  ;;  %734 = vst.msk [vmem:[%s1182_s27 + $0x34] sm:$0xf] %vm720_vm2, %v946_v19 }
 0x109   : > { %750 = vst.msk [vmem:[%s1182_s27 + $0x74] sm:$0xf] %vm720_vm2, %v962_v18 }
 0x10a PF: > { %s13_s14 = sadd.s32 1, %s1082_s14   ;;  %s1288_s12 = smov %s1078_s13 }
 0x10b   : > { %p10_p5 = scmp.ge.s32.totalorder %s13_s14, 4   ;;  %s1289_s13 = smov %s1291_s15 }
 0x10d   :  { %12 = sbr.rel (!%p10_p5) target bundleno = 2 (0x2), region = 68 }

</bundles_post_ra>
